<compile_context>
chip_gen: v7x
topology: tpu7x:2x2x1
jax: 0.10.0
libtpu: 0.0.40
codegen_flags: <defaults>
</compile_context>

<pallas_src>
import jax
import jax.numpy as jnp
from jax.experimental import pallas as pl
from jax.experimental.pallas import tpu as pltpu

LN_EPS = 1e-5


def ln_head_kernel(x_ref, w_ref, b_ref, o_ref):
    """Fused LayerNorm (affine folded into W/b) + Linear head.

    x_ref: (TM, D) f32 activations
    w_ref: (D, Npad) bf16 folded head weight
    b_ref: (1, Npad) f32 folded head bias
    o_ref: (TM, Npad) f32 logits
    """
    x = x_ref[...].astype(jnp.float32)                       # (TM, D)

    # Single-pass LN statistics: both cross-lane reductions issue back-to-back.
    inv_d = 1.0 / x.shape[-1]
    s1 = jnp.sum(x, axis=-1, keepdims=True)
    s2 = jnp.sum(x * x, axis=-1, keepdims=True)
    mean = s1 * inv_d
    var = jnp.maximum(s2 * inv_d - mean * mean, 0.0)          # guard tiny negatives
    xhat = (x - mean) * jax.lax.rsqrt(var + LN_EPS)           # f32 LN math

    # bf16 operands, f32 accumulation on the MXU.
    out = jnp.dot(xhat.astype(jnp.bfloat16), w_ref[...],
                  preferred_element_type=jnp.float32)
    o_ref[...] = (out + b_ref[...]).astype(o_ref.dtype)       # lane-dense store


def prepare_classifier_params(gamma, beta, w, b):
    """One-time parameter prep (call at init, NOT per forward call).

    gamma, beta: (D,) LayerNorm affine.
    w: (D, N) head weight (PyTorch nn.Linear stores (N, D); pass weight.T).
    b: (N,) head bias.

    Folds the LN affine into the head, pads N to a multiple of 128 for
    lane-dense output stores, and casts the weight to bf16.
    Returns (w_prep [D, Npad] bf16, b_prep [1, Npad] f32, N).
    """
    gamma = gamma.astype(jnp.float32)
    beta = beta.astype(jnp.float32)
    w = w.astype(jnp.float32)
    b = b.astype(jnp.float32)
    D, N = w.shape

    w_fold = gamma[:, None] * w                   # diag(gamma) @ W
    b_fold = b + beta @ w                         # beta @ W + b

    n_pad = ((N + 127) // 128) * 128
    if n_pad != N:
        w_fold = jnp.pad(w_fold, ((0, 0), (0, n_pad - N)))
        b_fold = jnp.pad(b_fold, (0, n_pad - N))

    return w_fold.astype(jnp.bfloat16), b_fold.reshape(1, n_pad), N


def _choose_tile_m(M, cap):
    """Row tile that avoids M padding.

    Small M -> one full tile (full-dim block is always legal, grid collapses).
    Large M -> largest sublane-aligned divisor of M <= cap, preferring an even
    step count so v7x's two TensorCores get equal work.  None -> caller pads.
    """
    if M <= cap:
        return M
    best = None
    for tm in range(cap, 127, -8):                # multiples of 8
        if M % tm == 0:
            if (M // tm) % 2 == 0:
                return tm
            if best is None:
                best = tm
    return best


def classifier_forward(x, w_prep, b_prep, n_out, *, tile_m_cap=1024,
                       trim_output=True):
    """x: (..., D) f32. Returns (..., n_out) f32 logits.

    With trim_output=False the Npad-padded logits are returned (production
    callers can mask the dead classes downstream and skip the extra pass).
    """
    orig_shape = x.shape
    D = orig_shape[-1]
    x2 = x.reshape(-1, D)
    M = x2.shape[0]
    n_pad = w_prep.shape[1]

    tile_m = _choose_tile_m(M, tile_m_cap)
    if tile_m is None:
        # Fallback only: awkward M with no aligned divisor.
        tile_m = tile_m_cap
        m_pad = pl.cdiv(M, tile_m) * tile_m
        x2 = jnp.pad(x2, ((0, m_pad - M), (0, 0)))
    else:
        m_pad = M

    out = pl.pallas_call(
        ln_head_kernel,
        out_shape=jax.ShapeDtypeStruct((m_pad, n_pad), jnp.float32),
        grid_spec=pltpu.PrefetchScalarGridSpec(
            num_scalar_prefetch=0,
            grid=(m_pad // tile_m,),
            in_specs=[
                pl.BlockSpec((tile_m, D), lambda i: (i, 0)),    # activations
                pl.BlockSpec((D, n_pad), lambda i: (0, 0)),     # folded W (bf16, invariant)
                pl.BlockSpec((1, n_pad), lambda i: (0, 0)),     # folded b (invariant)
            ],
            out_specs=pl.BlockSpec((tile_m, n_pad), lambda i: (i, 0)),
        ),
        compiler_params=pltpu.CompilerParams(
            dimension_semantics=("parallel",),
        ),
    )(x2, w_prep, b_prep)

    if m_pad != M:
        out = out[:M]
    if trim_output:
        return out[:, :n_out].reshape(*orig_shape[:-1], n_out)
    return out.reshape(*orig_shape[:-1], n_pad)


def reference_forward(x, gamma, beta, w, b):
    mean = jnp.mean(x, axis=-1, keepdims=True)
    var = jnp.mean((x - mean) ** 2, axis=-1, keepdims=True)
    h = (x - mean) / jnp.sqrt(var + LN_EPS) * gamma + beta
    return h @ w + b


if __name__ == "__main__":
    input_dim, output_dim = 192, 1000
    batch, seq = 2, 8   # forward accepts any (..., input_dim)

    key = jax.random.PRNGKey(0)
    kx, kw, kb, kg, kbt = jax.random.split(key, 5)

    x = jax.random.normal(kx, (batch, seq, input_dim), dtype=jnp.float32)

    # Synthetic nn.LayerNorm / nn.Linear parameters (non-trivial affine so the
    # folded-parameter path is actually exercised).
    gamma = 1.0 + 0.1 * jax.random.normal(kg, (input_dim,), dtype=jnp.float32)
    beta = 0.1 * jax.random.normal(kbt, (input_dim,), dtype=jnp.float32)
    bound = 1.0 / jnp.sqrt(input_dim)
    w = jax.random.uniform(kw, (input_dim, output_dim), jnp.float32, -bound, bound)  # = torch weight.T
    b = jax.random.uniform(kb, (output_dim,), jnp.float32, -bound, bound)

    # One-time parameter prep (fold LN affine, pad N, bf16 weight cast).
    w_prep, b_prep, n_out = prepare_classifier_params(gamma, beta, w, b)

    fwd = jax.jit(lambda xx: classifier_forward(xx, w_prep, b_prep, n_out))
    out = fwd(x)
    jax.block_until_ready(out)

    ref = reference_forward(x, gamma, beta, w, b)
    assert out.shape == (batch, seq, output_dim)
    # bf16 matmul operands with f32 accumulation -> loosened tolerance.
    err = float(jnp.max(jnp.abs(out - ref)))
    assert jnp.allclose(out, ref, atol=2e-2, rtol=2e-2), f"max abs err {err}"

    print("KERNEL_OK")
</pallas_src>

<mosaic_0001>
module attributes {stable_mosaic.version = 11 : i64} {
  func.func @ln_head_kernel(%arg0: i32, %arg1: memref<16x192xf32, #tpu.memory_space<vmem>>, %arg2: memref<192x1024xbf16, #tpu.memory_space<vmem>>, %arg3: memref<1x1024xf32, #tpu.memory_space<vmem>>, %arg4: memref<16x1024xf32, #tpu.memory_space<vmem>>) attributes {dimension_semantics = [#tpu.dimension_semantics<parallel>], iteration_bounds = array<i64: 1>, scalar_prefetch = 0 : i64, scratch_operands = 0 : i64, tpu.core_type = #tpu.core_type<tc>, window_params = [{transform_indices = @transform_0, window_bounds = array<i64: 16, 192>}, {pipeline_mode = #tpu.pipeline_mode<synchronous>, transform_indices = @transform_1, window_bounds = array<i64: 192, 1024>}, {pipeline_mode = #tpu.pipeline_mode<synchronous>, transform_indices = @transform_2, window_bounds = array<i64: 1, 1024>}, {transform_indices = @transform_3, window_bounds = array<i64: 16, 1024>}]} {
    %c0 = arith.constant 0 : index
    %c0_0 = arith.constant 0 : index
    %0 = vector.load %arg1[%c0, %c0_0] : memref<16x192xf32, #tpu.memory_space<vmem>>, vector<16x192xf32>
    %cst = arith.constant dense<0.000000e+00> : vector<16xf32>
    %1 = vector.multi_reduction <add>, %0, %cst [1] : vector<16x192xf32> to vector<16xf32>
    %2 = vector.shape_cast %1 : vector<16xf32> to vector<16x1xf32>
    %3 = arith.mulf %0, %0 : vector<16x192xf32>
    %cst_1 = arith.constant dense<0.000000e+00> : vector<16xf32>
    %4 = vector.multi_reduction <add>, %3, %cst_1 [1] : vector<16x192xf32> to vector<16xf32>
    %5 = vector.shape_cast %4 : vector<16xf32> to vector<16x1xf32>
    %cst_2 = arith.constant 0.00520833349 : f32
    %6 = vector.broadcast %cst_2 : f32 to vector<16x1xf32>
    %7 = arith.mulf %2, %6 : vector<16x1xf32>
    %cst_3 = arith.constant 0.00520833349 : f32
    %8 = vector.broadcast %cst_3 : f32 to vector<16x1xf32>
    %9 = arith.mulf %5, %8 : vector<16x1xf32>
    %10 = arith.mulf %7, %7 : vector<16x1xf32>
    %11 = arith.subf %9, %10 : vector<16x1xf32>
    %cst_4 = arith.constant 0.000000e+00 : f32
    %12 = vector.broadcast %cst_4 : f32 to vector<16x1xf32>
    %13 = arith.maximumf %11, %12 : vector<16x1xf32>
    %14 = vector.broadcast %7 : vector<16x1xf32> to vector<16x192xf32>
    %15 = arith.subf %0, %14 : vector<16x192xf32>
    %cst_5 = arith.constant 9.99999974E-6 : f32
    %16 = vector.broadcast %cst_5 : f32 to vector<16x1xf32>
    %17 = arith.addf %13, %16 : vector<16x1xf32>
    %18 = math.rsqrt %17 : vector<16x1xf32>
    %19 = vector.broadcast %18 : vector<16x1xf32> to vector<16x192xf32>
    %20 = arith.mulf %15, %19 : vector<16x192xf32>
    %21 = arith.truncf %20 : vector<16x192xf32> to vector<16x192xbf16>
    %c0_6 = arith.constant 0 : index
    %c0_7 = arith.constant 0 : index
    %22 = vector.load %arg2[%c0_6, %c0_7] : memref<192x1024xbf16, #tpu.memory_space<vmem>>, vector<192x1024xbf16>
    %cst_8 = arith.constant dense<0.000000e+00> : vector<16x1024xf32>
    %23 = tpu.matmul %21, %22, %cst_8 {dimension_numbers = #tpu.dot_dimension_numbers<[1], [0], [0], [1], [0, 0, 1, 1], [], []>} : vector<16x192xbf16>, vector<192x1024xbf16>, vector<16x1024xf32> -> vector<16x1024xf32>
    %c0_9 = arith.constant 0 : index
    %c0_10 = arith.constant 0 : index
    %24 = vector.load %arg3[%c0_9, %c0_10] : memref<1x1024xf32, #tpu.memory_space<vmem>>, vector<1x1024xf32>
    %25 = vector.broadcast %24 : vector<1x1024xf32> to vector<16x1024xf32>
    %26 = arith.addf %23, %25 : vector<16x1024xf32>
    %c0_11 = arith.constant 0 : index
    %c0_12 = arith.constant 0 : index
    %27 = vector.load %arg4[%c0_11, %c0_12] : memref<16x1024xf32, #tpu.memory_space<vmem>>, vector<16x1024xf32>
    tpu.vector_store %arg4[%c0_11, %c0_12], %26 {strides = array<i32>} : memref<16x1024xf32, #tpu.memory_space<vmem>>, vector<16x1024xf32>,
    return
  }
  func.func @transform_0(%arg0: i32) -> (i32, i32) {
    %c0_i32 = arith.constant 0 : i32
    %c0_i32_0 = arith.constant 0 : i32
    return %arg0, %c0_i32 : i32, i32
  }
  func.func @transform_1(%arg0: i32) -> (i32, i32) {
    %c0_i32 = arith.constant 0 : i32
    %c0_i32_0 = arith.constant 0 : i32
    %c0_i32_1 = arith.constant 0 : i32
    return %c0_i32, %c0_i32_0 : i32, i32
  }
  func.func @transform_2(%arg0: i32) -> (i32, i32) {
    %c0_i32 = arith.constant 0 : i32
    %c0_i32_0 = arith.constant 0 : i32
    %c0_i32_1 = arith.constant 0 : i32
    return %c0_i32, %c0_i32_0 : i32, i32
  }
  func.func @transform_3(%arg0: i32) -> (i32, i32) {
    %c0_i32 = arith.constant 0 : i32
    %c0_i32_0 = arith.constant 0 : i32
    return %arg0, %c0_i32 : i32, i32
  }
}

</mosaic_0001>

<bundles_post_ra>
// kernel: _lambda_.1
= control target key start
LH: loop header
LB: loop body
LE: loop exit
PB: predicated region body
PF: predicated region fallthrough
CT: control target
= control target key end

     0   :  { %vm19_vm0 = vcmask 523264   ;;  %s1390_s0 = inlined_call_operand.vmem [shape: f32[16,192], index: 0, kind: input, shape index: {}]   ;;  %s1391_s1 = inlined_call_operand.vmem [shape: bf16[192,1024], index: 1, kind: input, shape index: {}]   ;;  %s1392_s2 = inlined_call_operand.vmem [shape: f32[1,1024], index: 2, kind: input, shape index: {}]   ;;  %s1393_s3 = inlined_call_operand.vmem [shape: f32[16,1024], index: 3, kind: output, shape index: {}]  }
   0x1   :  { %v1004_v0 = vld [vmem:[%s1390_s0] sm:$0xff]  ;;  %v1009_v1 = vld [vmem:[%s1390_s0 + $0x8] sm:$0xff]  ;;  %v1014_v2 = vld [vmem:[%s1390_s0 + $0x10] sm:$0xff] }
   0x2   :  { %v20_v3 = vsel %vm19_vm0, %v1009_v1, 0.0  ;;  %v28_v4 = vmul.f32 %v1004_v0, %v1004_v0  ;;  %v29_v5 = vmul.f32 %v1009_v1, %v1009_v1  ;;  %v1025_v6 = vld [vmem:[%s1390_s0 + $0x18] sm:$0xff]  ;;  %v30_v7 = vmul.f32 %v1014_v2, %v1014_v2  ;;  %v64_v8 = vld [vmem:[%s1391_s1] sm:$0xff]  ;;  %v65_v14 = vld [vmem:[%s1391_s1 + $0x8] sm:$0xff] }
   0x3   :  { %v68_v9 = vld [vmem:[%s1391_s1 + $0x20] sm:$0xff]  ;;  %v21_v10 = vadd.f32 %v20_v3, %v1004_v0  ;;  %v24_v11 = vsel %vm19_vm0, %v1025_v6, 0.0  ;;  %v31_v12 = vmul.f32 %v1025_v6, %v1025_v6  ;;  %v69_v15 = vld [vmem:[%s1391_s1 + $0x28] sm:$0xff] }
   0x4   :  { %v878_v13 = vcombine.high %v64_v8, %v68_v9  ;;  %v72_v16 = vld [vmem:[%s1391_s1 + $0x40] sm:$0xff]  ;;  %v32_v17 = vsel %vm19_vm0, %v29_v5, 0.0  ;;  %v25_v18 = vadd.f32 %v24_v11, %v1014_v2  ;;  %v880_v19 = vcombine.high %v65_v14, %v69_v15  ;;  %v73_v22 = vld [vmem:[%s1391_s1 + $0x48] sm:$0xff] }
   0x5   :  { %v877_v20 = vcombine.low %v64_v8, %v68_v9  ;;  %v76_v21 = vld [vmem:[%s1391_s1 + $0x60] sm:$0xff]  ;;  %v77_v23 = vld [vmem:[%s1391_s1 + $0x68] sm:$0xff]  ;;  %22 = vadd.xlane.f32.xlu0 %v21_v10  ;;  %v33_v24 = vadd.f32 %v32_v17, %v28_v4  ;;  %v36_v25 = vsel %vm19_vm0, %v31_v12, 0.0  ;;  %v879_v26 = vcombine.low %v65_v14, %v69_v15 }
   0x6   :  { %685 = vmatprep.subr.bf16.mxu0 %v878_v13  ;;  %v886_v27 = vcombine.high %v72_v16, %v76_v21  ;;  %v80_v28 = vld [vmem:[%s1391_s1 + $0x80] sm:$0xff]  ;;  %v81_v30 = vld [vmem:[%s1391_s1 + $0x88] sm:$0xff]  ;;  %728 = vmatprep.subr.bf16.mxu1 %v880_v19  ;;  %v888_v31 = vcombine.high %v73_v22, %v77_v23  ;;  %v885_v32 = vcombine.low %v72_v16, %v76_v21 }
   0x7   :  { %v84_v29 = vld [vmem:[%s1391_s1 + $0xa0] sm:$0xff]  ;;  %686 = vmatpush1.bf16.msra.mxu0 %v877_v20  ;;  %v85_v33 = vld [vmem:[%s1391_s1 + $0xa8] sm:$0xff]  ;;  %34 = vadd.xlane.f32.xlu1 %v33_v24  ;;  %v37_v34 = vadd.f32 %v36_v25, %v30_v7  ;;  %v887_v35 = vcombine.low %v73_v22, %v77_v23 }
   0x8   :  { %729 = vmatpush1.bf16.msra.mxu1 %v879_v26  ;;  %687 = vmatprep.subr.bf16.mxu0 %v886_v27  ;;  %v894_v36 = vcombine.high %v80_v28, %v84_v29  ;;  %v896_v37 = vcombine.high %v81_v30, %v85_v33  ;;  %v88_v38 = vld [vmem:[%s1391_s1 + $0xc0] sm:$0xff]  ;;  %v89_v40 = vld [vmem:[%s1391_s1 + $0xc8] sm:$0xff]  ;;  %v893_v42 = vcombine.low %v80_v28, %v84_v29 }
   0x9   :  { %730 = vmatprep.subr.bf16.mxu1 %v888_v31  ;;  %v92_v39 = vld [vmem:[%s1391_s1 + $0xe0] sm:$0xff]  ;;  %26 = vadd.xlane.f32.xlu0 %v25_v18  ;;  %v93_v41 = vld [vmem:[%s1391_s1 + $0xe8] sm:$0xff]  ;;  %v895_v43 = vcombine.low %v81_v30, %v85_v33 }
   0xa   :  { %v902_v44 = vcombine.high %v88_v38, %v92_v39  ;;  %v904_v45 = vcombine.high %v89_v40, %v93_v41  ;;  %v96_v46 = vld [vmem:[%s1391_s1 + $0x100] sm:$0xff]  ;;  %v97_v48 = vld [vmem:[%s1391_s1 + $0x108] sm:$0xff]  ;;  %v901_v50 = vcombine.low %v88_v38, %v92_v39  ;;  %v903_v51 = vcombine.low %v89_v40, %v93_v41 }
   0xb   :  { %688 = vmatpush1.bf16.msra.mxu0 %v885_v32  ;;  %38 = vadd.xlane.f32.xlu1 %v37_v34  ;;  %v100_v47 = vld [vmem:[%s1391_s1 + $0x120] sm:$0xff]  ;;  %v101_v49 = vld [vmem:[%s1391_s1 + $0x128] sm:$0xff] }
   0xc   :  { %731 = vmatpush1.bf16.msra.mxu1 %v887_v35  ;;  %689 = vmatprep.subr.bf16.mxu0 %v894_v36  ;;  %v910_v52 = vcombine.high %v96_v46, %v100_v47  ;;  %v912_v53 = vcombine.high %v97_v48, %v101_v49  ;;  %v104_v54 = vld [vmem:[%s1391_s1 + $0x140] sm:$0xff]  ;;  %v105_v56 = vld [vmem:[%s1391_s1 + $0x148] sm:$0xff]  ;;  %v909_v57 = vcombine.low %v96_v46, %v100_v47 }
   0xd   :  { %732 = vmatprep.subr.bf16.mxu1 %v896_v37  ;;  %v108_v55 = vld [vmem:[%s1391_s1 + $0x160] sm:$0xff]  ;;  %v109_v58 = vld [vmem:[%s1391_s1 + $0x168] sm:$0xff]  ;;  %v911_v59 = vcombine.low %v97_v48, %v101_v49 }
   0xe   :  { %v918_v60 = vcombine.high %v104_v54, %v108_v55  ;;  %v920_v61 = vcombine.high %v105_v56, %v109_v58  ;;  %v112_v62 = vld [vmem:[%s1391_s1 + $0x180] sm:$0xff]  ;;  %v113_v3 = vld [vmem:[%s1391_s1 + $0x188] sm:$0xff]  ;;  %v917_v4 = vcombine.low %v104_v54, %v108_v55  ;;  %v919_v7 = vcombine.low %v105_v56, %v109_v58  ;;  %v71_v56 = vld [vmem:[%s1391_s1 + $0x38] sm:$0xff] }
   0xf   :  { %690 = vmatpush1.bf16.msra.mxu0 %v893_v42  ;;  %v116_v63 = vld [vmem:[%s1391_s1 + $0x1a0] sm:$0xff]  ;;  %v117_v5 = vld [vmem:[%s1391_s1 + $0x1a8] sm:$0xff] }
  0x10   :  { %733 = vmatpush1.bf16.msra.mxu1 %v895_v43  ;;  %691 = vmatprep.subr.bf16.mxu0 %v902_v44  ;;  %v926_v8 = vcombine.high %v112_v62, %v116_v63  ;;  %v928_v9 = vcombine.high %v113_v3, %v117_v5  ;;  %v925_v10 = vcombine.low %v112_v62, %v116_v63  ;;  %v120_v11 = vld [vmem:[%s1391_s1 + $0x1c0] sm:$0xff]  ;;  %v121_v13 = vld [vmem:[%s1391_s1 + $0x1c8] sm:$0xff] }
  0x11   :  { %734 = vmatprep.subr.bf16.mxu1 %v904_v45  ;;  %v124_v12 = vld [vmem:[%s1391_s1 + $0x1e0] sm:$0xff]  ;;  %v927_v14 = vcombine.low %v113_v3, %v117_v5  ;;  %v125_v16 = vld [vmem:[%s1391_s1 + $0x1e8] sm:$0xff] }
  0x12   :  { %v934_v15 = vcombine.high %v120_v11, %v124_v12  ;;  %v936_v17 = vcombine.high %v121_v13, %v125_v16  ;;  %v933_v18 = vcombine.low %v120_v11, %v124_v12  ;;  %v128_v19 = vld [vmem:[%s1391_s1 + $0x200] sm:$0xff]  ;;  %v129_v21 = vld [vmem:[%s1391_s1 + $0x208] sm:$0xff]  ;;  %v935_v22 = vcombine.low %v121_v13, %v125_v16 }
  0x13   :  { %692 = vmatpush1.bf16.msra.mxu0 %v901_v50  ;;  %v132_v20 = vld [vmem:[%s1391_s1 + $0x220] sm:$0xff]  ;;  %v133_v24 = vld [vmem:[%s1391_s1 + $0x228] sm:$0xff] }
  0x14   :  { %735 = vmatpush1.bf16.msra.mxu1 %v903_v51  ;;  %693 = vmatprep.subr.bf16.mxu0 %v910_v52  ;;  %v942_v23 = vcombine.high %v128_v19, %v132_v20  ;;  %v944_v25 = vcombine.high %v129_v21, %v133_v24  ;;  %v941_v26 = vcombine.low %v128_v19, %v132_v20  ;;  %v136_v27 = vld [vmem:[%s1391_s1 + $0x240] sm:$0xff]  ;;  %v137_v29 = vld [vmem:[%s1391_s1 + $0x248] sm:$0xff]  ;;  %v66_v51 = vld [vmem:[%s1391_s1 + $0x10] sm:$0xff] }
  0x15   :  { %736 = vmatprep.subr.bf16.mxu1 %v912_v53  ;;  %v140_v28 = vld [vmem:[%s1391_s1 + $0x260] sm:$0xff]  ;;  %v943_v30 = vcombine.low %v129_v21, %v133_v24  ;;  %v141_v32 = vld [vmem:[%s1391_s1 + $0x268] sm:$0xff]  ;;  %v70_v52 = vld [vmem:[%s1391_s1 + $0x30] sm:$0xff] }
  0x16   :  { %v950_v31 = vcombine.high %v136_v27, %v140_v28  ;;  %v952_v33 = vcombine.high %v137_v29, %v141_v32  ;;  %v144_v34 = vld [vmem:[%s1391_s1 + $0x280] sm:$0xff]  ;;  %v145_v36 = vld [vmem:[%s1391_s1 + $0x288] sm:$0xff]  ;;  %v949_v38 = vcombine.low %v136_v27, %v140_v28  ;;  %v951_v39 = vcombine.low %v137_v29, %v141_v32  ;;  %v67_v53 = vld [vmem:[%s1391_s1 + $0x18] sm:$0xff] }
  0x17   :  { %694 = vmatpush1.bf16.msra.mxu0 %v909_v57  ;;  %v148_v35 = vld [vmem:[%s1391_s1 + $0x2a0] sm:$0xff]  ;;  %v149_v37 = vld [vmem:[%s1391_s1 + $0x2a8] sm:$0xff]  ;;  %v882_v55 = vcombine.high %v66_v51, %v70_v52  ;;  %v881_v57 = vcombine.low %v66_v51, %v70_v52  ;;  %v883_v58 = vcombine.low %v67_v53, %v71_v56  ;;  %v78_v27 = vld [vmem:[%s1391_s1 + $0x70] sm:$0xff] }
  0x18   :  { %737 = vmatpush1.bf16.msra.mxu1 %v911_v59  ;;  %695 = vmatprep.subr.bf16.mxu0 %v918_v60  ;;  %v958_v40 = vcombine.high %v144_v34, %v148_v35  ;;  %v960_v41 = vcombine.high %v145_v36, %v149_v37  ;;  %v152_v42 = vld [vmem:[%s1391_s1 + $0x2c0] sm:$0xff]  ;;  %v153_v44 = vld [vmem:[%s1391_s1 + $0x2c8] sm:$0xff]  ;;  %v957_v46 = vcombine.low %v144_v34, %v148_v35  ;;  %v82_v28 = vld [vmem:[%s1391_s1 + $0x90] sm:$0xff] }
  0x19   :  { %738 = vmatprep.subr.bf16.mxu1 %v920_v61  ;;  %v156_v43 = vld [vmem:[%s1391_s1 + $0x2e0] sm:$0xff]  ;;  %v157_v45 = vld [vmem:[%s1391_s1 + $0x2e8] sm:$0xff]  ;;  %v959_v47 = vcombine.low %v145_v36, %v149_v37  ;;  %v884_v59 = vcombine.high %v67_v53, %v71_v56  ;;  %v83_v32 = vld [vmem:[%s1391_s1 + $0x98] sm:$0xff] }
  0x1a   :  { %v966_v48 = vcombine.high %v152_v42, %v156_v43  ;;  %v968_v49 = vcombine.high %v153_v44, %v157_v45  ;;  %v965_v50 = vcombine.low %v152_v42, %v156_v43  ;;  %v967_v54 = vcombine.low %v153_v44, %v157_v45  ;;  %v107_v56 = vld [vmem:[%s1391_s1 + $0x158] sm:$0xff] }
  0x1b   :  { %696 = vmatpush1.bf16.msra.mxu0 %v917_v4 }
  0x1c   :  { %739 = vmatpush1.bf16.msra.mxu1 %v919_v7  ;;  %697 = vmatprep.subr.bf16.mxu0 %v926_v8 }
  0x1d   :  { %740 = vmatprep.subr.bf16.mxu1 %v928_v9 }
  0x1f   :  { %698 = vmatpush1.bf16.msra.mxu0 %v925_v10 }
  0x20   :  { %741 = vmatpush1.bf16.msra.mxu1 %v927_v14  ;;  %699 = vmatprep.subr.bf16.mxu0 %v934_v15 }
  0x21   :  { %742 = vmatprep.subr.bf16.mxu1 %v936_v17 }
  0x23   :  { %700 = vmatpush1.bf16.msra.mxu0 %v933_v18 }
  0x24   :  { %743 = vmatpush1.bf16.msra.mxu1 %v935_v22  ;;  %701 = vmatprep.subr.bf16.mxu0 %v942_v23 }
  0x25   :  { %744 = vmatprep.subr.bf16.mxu1 %v944_v25 }
  0x27   :  { %702 = vmatpush1.bf16.msra.mxu0 %v941_v26  ;;  %v74_v26 = vld [vmem:[%s1391_s1 + $0x50] sm:$0xff] }
  0x28   :  { %745 = vmatpush1.bf16.msra.mxu1 %v943_v30  ;;  %703 = vmatprep.subr.bf16.mxu0 %v950_v31  ;;  %v890_v29 = vcombine.high %v74_v26, %v78_v27  ;;  %v86_v31 = vld [vmem:[%s1391_s1 + $0xb0] sm:$0xff]  ;;  %v889_v34 = vcombine.low %v74_v26, %v78_v27 }
  0x29   :  { %746 = vmatprep.subr.bf16.mxu1 %v952_v33  ;;  %v87_v33 = vld [vmem:[%s1391_s1 + $0xb8] sm:$0xff]  ;;  %v898_v36 = vcombine.high %v82_v28, %v86_v31  ;;  %v897_v42 = vcombine.low %v82_v28, %v86_v31  ;;  %v138_v26 = vld [vmem:[%s1391_s1 + $0x250] sm:$0xff] }
  0x2a   :  { %v900_v37 = vcombine.high %v83_v32, %v87_v33  ;;  %v899_v43 = vcombine.low %v83_v32, %v87_v33  ;;  %v142_v27 = vld [vmem:[%s1391_s1 + $0x270] sm:$0xff]  ;;  %v147_v33 = vld [vmem:[%s1391_s1 + $0x298] sm:$0xff] }
  0x2b   :  { %704 = vmatpush1.bf16.msra.mxu0 %v949_v38  ;;  %v90_v38 = vld [vmem:[%s1391_s1 + $0xd0] sm:$0xff] }
  0x2c   :  { %747 = vmatpush1.bf16.msra.mxu1 %v951_v39  ;;  %705 = vmatprep.subr.bf16.mxu0 %v958_v40  ;;  %v94_v39 = vld [vmem:[%s1391_s1 + $0xf0] sm:$0xff]  ;;  %v91_v40 = vld [vmem:[%s1391_s1 + $0xd8] sm:$0xff] }
  0x2d   :  { %748 = vmatprep.subr.bf16.mxu1 %v960_v41  ;;  %v95_v41 = vld [vmem:[%s1391_s1 + $0xf8] sm:$0xff]  ;;  %v906_v44 = vcombine.high %v90_v38, %v94_v39  ;;  %v146_v31 = vld [vmem:[%s1391_s1 + $0x290] sm:$0xff] }
  0x2e   :  { %v908_v45 = vcombine.high %v91_v40, %v95_v41  ;;  %v907_v51 = vcombine.low %v91_v40, %v95_v41  ;;  %v150_v32 = vld [vmem:[%s1391_s1 + $0x2b0] sm:$0xff]  ;;  %v155_v41 = vld [vmem:[%s1391_s1 + $0x2d8] sm:$0xff] }
  0x2f   :  { %706 = vmatpush1.bf16.msra.mxu0 %v957_v46  ;;  %v98_v46 = vld [vmem:[%s1391_s1 + $0x110] sm:$0xff] }
  0x30   :  { %749 = vmatpush1.bf16.msra.mxu1 %v959_v47  ;;  %707 = vmatprep.subr.bf16.mxu0 %v966_v48  ;;  %v102_v47 = vld [vmem:[%s1391_s1 + $0x130] sm:$0xff]  ;;  %v99_v48 = vld [vmem:[%s1391_s1 + $0x118] sm:$0xff] }
  0x31   :  { %750 = vmatprep.subr.bf16.mxu1 %v968_v49  ;;  %v103_v49 = vld [vmem:[%s1391_s1 + $0x138] sm:$0xff]  ;;  %v914_v52 = vcombine.high %v98_v46, %v102_v47  ;;  %v158_v40 = vld [vmem:[%s1391_s1 + $0x2f0] sm:$0xff] }
  0x32   :  { %v916_v53 = vcombine.high %v99_v48, %v103_v49 }
  0x33   :  { %708 = vmatpush1.bf16.msra.mxu0 %v965_v50  ;;  %v905_v50 = vcombine.low %v90_v38, %v94_v39  ;;  %v154_v39 = vld [vmem:[%s1391_s1 + $0x2d0] sm:$0xff] }
  0x34   :  { %751 = vmatpush1.bf16.msra.mxu1 %v967_v54  ;;  %771 = vmatprep.subr.bf16.mxu0 %v882_v55  ;;  %v106_v54 = vld [vmem:[%s1391_s1 + $0x150] sm:$0xff] }
  0x35   :  { %814 = vmatprep.subr.bf16.mxu1 %v884_v59  ;;  %v110_v55 = vld [vmem:[%s1391_s1 + $0x170] sm:$0xff]  ;;  %v915_v59 = vcombine.low %v99_v48, %v103_v49  ;;  %v162_v49 = vlaneseq }
  0x92   :  { %v23_v60 = vpop.xlane.xlu0 %22 }
  0x93   :  { %v40_v61 = vmul.f32 0.0052083335, %v23_v60  ;;  %v922_v60 = vcombine.high %v106_v54, %v110_v55 }
  0x94   :  { %v35_v62 = vpop.xlane.xlu1 %34 }
  0x95   :  { %v42_v63 = vmul.f32 0.0052083335, %v35_v62  ;;  %v44_v3 = vmul.f32 %v40_v61, %v40_v61  ;;  %v50_v17 = vsub.f32 %v1004_v0, %v40_v61  ;;  %v51_v18 = vsub.f32 %v1009_v1, %v40_v61  ;;  %v75_v0 = vld [vmem:[%s1391_s1 + $0x58] sm:$0xff]  ;;  %v114_v62 = vld [vmem:[%s1391_s1 + $0x190] sm:$0xff] }
  0x96   :  { %v27_v4 = vpop.xlane.xlu0 %26  ;;  %v79_v1 = vld [vmem:[%s1391_s1 + $0x78] sm:$0xff] }
  0x97   :  { %v46_v5 = vsub.f32 %v42_v63, %v44_v3  ;;  %v41_v7 = vmul.f32 0.0052083335, %v27_v4  ;;  %v892_v30 = vcombine.high %v75_v0, %v79_v1  ;;  %v891_v35 = vcombine.low %v75_v0, %v79_v1  ;;  %v118_v63 = vld [vmem:[%s1391_s1 + $0x1b0] sm:$0xff]  ;;  %v115_v3 = vld [vmem:[%s1391_s1 + $0x198] sm:$0xff] }
  0x98   :  { %v39_v8 = vpop.xlane.xlu1 %38  ;;  %v119_v4 = vld [vmem:[%s1391_s1 + $0x1b8] sm:$0xff] }
  0x99   :  { %v48_v9 = vmax.f32 %v46_v5, 0.0  ;;  %v43_v10 = vmul.f32 0.0052083335, %v39_v8  ;;  %v45_v11 = vmul.f32 %v41_v7, %v41_v7  ;;  %v52_v19 = vsub.f32 %v1014_v2, %v41_v7  ;;  %v139_v0 = vld [vmem:[%s1391_s1 + $0x258] sm:$0xff] }
  0x9a   :  { %v53_v20 = vsub.f32 %v1025_v6, %v41_v7  ;;  %v921_v5 = vcombine.low %v106_v54, %v110_v55  ;;  %v930_v8 = vcombine.high %v114_v62, %v118_v63  ;;  %v143_v1 = vld [vmem:[%s1391_s1 + $0x278] sm:$0xff] }
  0x9b   :  { %v54_v12 = vadd.f32 1e-05, %v48_v9  ;;  %v47_v13 = vsub.f32 %v43_v10, %v45_v11  ;;  %v932_v9 = vcombine.high %v115_v3, %v119_v4  ;;  %v122_v10 = vld [vmem:[%s1391_s1 + $0x1d0] sm:$0xff] }
  0x9c   :  { %v126_v11 = vld [vmem:[%s1391_s1 + $0x1f0] sm:$0xff] }
  0x9d   :  { %v49_v14 = vmax.f32 %v47_v13, 0.0  ;;  %977 = vrsqrt.f32 %v54_v12  ;;  %v123_v12 = vld [vmem:[%s1391_s1 + $0x1d8] sm:$0xff] }
  0x9e   :  { %v127_v13 = vld [vmem:[%s1391_s1 + $0x1f8] sm:$0xff] }
  0x9f   :  { %v55_v15 = vadd.f32 1e-05, %v49_v14  ;;  %v929_v14 = vcombine.low %v114_v62, %v118_v63 }
  0xa1   :  { %979 = vrsqrt.f32 %v55_v15  ;;  %v931_v15 = vcombine.low %v115_v3, %v119_v4 }
  0xa7   :  { %v978_v16 = vpop.eup %977 }
  0xa8   :  { %v59_v22 = vmul.f32 %v978_v16, %v51_v18  ;;  %v58_v24 = vmul.f32 %v978_v16, %v50_v17  ;;  %v938_v16 = vcombine.high %v122_v10, %v126_v11  ;;  %v940_v17 = vcombine.high %v123_v12, %v127_v13  ;;  %v130_v18 = vld [vmem:[%s1391_s1 + $0x210] sm:$0xff] }
  0xab   :  { %v980_v21 = vpop.eup %979 }
  0xac   :  { %v61_v23 = vmul.f32 %v980_v21, %v53_v20  ;;  %v60_v25 = vmul.f32 %v980_v21, %v52_v19  ;;  %v134_v19 = vld [vmem:[%s1391_s1 + $0x230] sm:$0xff]  ;;  %v131_v20 = vld [vmem:[%s1391_s1 + $0x218] sm:$0xff] }
  0xad   :  { %v135_v21 = vld [vmem:[%s1391_s1 + $0x238] sm:$0xff] }
  0xae   :  { %v63_v2 = vpack.c.bf16 %v61_v23, %v59_v22  ;;  %v1209_v6 = vpack.c.bf16 %v60_v25, %v58_v24  ;;  %v937_v22 = vcombine.low %v122_v10, %v126_v11  ;;  %v939_v23 = vcombine.low %v123_v12, %v127_v13 }
  0xaf   :  { %v946_v24 = vcombine.high %v130_v18, %v134_v19  ;;  %v948_v25 = vcombine.high %v131_v20, %v135_v21  ;;  %v947_v28 = vcombine.low %v131_v20, %v135_v21 }
  0xb0   :  { %973 = vmatprep.mubr.msk.bf16.mxu0 %vm19_vm0, %v63_v2  ;;  %974 = vmatprep.mubr.msk.bf16.mxu1 %vm19_vm0, %v63_v2 }
  0xb1   :  { %718 = vmatmul.mubr.bf16.vlgmr.msra.gmra.mrb[0].mxu0 %v1209_v6  ;;  %761 = vmatmul.mubr.bf16.vlgmr.msra.gmra.mrb[0].mxu1 %v1209_v6 }
  0xb2   :  { %772 = vmatpush1.bf16.msra.mxu0 %v881_v57  ;;  %815 = vmatpush1.bf16.msra.mxu1 %v883_v58  ;;  %v111_v57 = vld [vmem:[%s1391_s1 + $0x178] sm:$0xff]  ;;  %v913_v58 = vcombine.low %v98_v46, %v102_v47  ;;  %v969_v47 = vcombine.low %v154_v39, %v158_v40 }
  0xb3   :  { %975 = vmatprep.mubr.msk.bf16.mxu0 %vm19_vm0, %v63_v2  ;;  %976 = vmatprep.mubr.msk.bf16.mxu1 %vm19_vm0, %v63_v2  ;;  %v924_v61 = vcombine.high %v107_v56, %v111_v57  ;;  %v923_v7 = vcombine.low %v107_v56, %v111_v57  ;;  %v945_v2 = vcombine.low %v130_v18, %v134_v19 }
  0xb4   :  { %773 = vmatprep.subr.bf16.mxu0 %v890_v29  ;;  %816 = vmatprep.subr.bf16.mxu1 %v892_v30  ;;  %v954_v29 = vcombine.high %v138_v26, %v142_v27  ;;  %v956_v30 = vcombine.high %v139_v0, %v143_v1 }
  0xb6   :  { %774 = vmatpush1.bf16.msra.mxu0 %v889_v34  ;;  %817 = vmatpush1.bf16.msra.mxu1 %v891_v35  ;;  %v151_v34 = vld [vmem:[%s1391_s1 + $0x2b8] sm:$0xff]  ;;  %v953_v35 = vcombine.low %v138_v26, %v142_v27 }
  0xb7   :  { %775 = vmatprep.subr.bf16.mxu0 %v898_v36  ;;  %818 = vmatprep.subr.bf16.mxu1 %v900_v37  ;;  %v955_v36 = vcombine.low %v139_v0, %v143_v1  ;;  %v962_v37 = vcombine.high %v146_v31, %v150_v32  ;;  %v964_v38 = vcombine.high %v147_v33, %v151_v34 }
  0xba   :  { %776 = vmatpush1.bf16.msra.mxu0 %v897_v42  ;;  %819 = vmatpush1.bf16.msra.mxu1 %v899_v43  ;;  %v159_v42 = vld [vmem:[%s1391_s1 + $0x2f8] sm:$0xff]  ;;  %v961_v43 = vcombine.low %v146_v31, %v150_v32 }
  0xbb   :  { %777 = vmatprep.subr.bf16.mxu0 %v906_v44  ;;  %820 = vmatprep.subr.bf16.mxu1 %v908_v45  ;;  %v963_v44 = vcombine.low %v147_v33, %v151_v34  ;;  %v970_v45 = vcombine.high %v154_v39, %v158_v40  ;;  %v972_v46 = vcombine.high %v155_v41, %v159_v42 }
  0xbc   :  { %v971_v48 = vcombine.low %v155_v41, %v159_v42 }
  0xbe   :  { %778 = vmatpush1.bf16.msra.mxu0 %v905_v50  ;;  %821 = vmatpush1.bf16.msra.mxu1 %v907_v51  ;;  %v163_v50 = vshrl.u32 %v162_v49, 7 }
  0xbf   :  { %779 = vmatprep.subr.bf16.mxu0 %v914_v52  ;;  %822 = vmatprep.subr.bf16.mxu1 %v916_v53  ;;  %v160_v53 = vld [vmem:[%s1392_s2] sm:$0xff] }
  0xc0   :  { %v164_v51 = vsub.s32 0, %v163_v50  ;;  %v172_v52 = vsub.s32 2, %v163_v50  ;;  %v168_v54 = vsub.s32 1, %v163_v50  ;;  %v176_v55 = vsub.s32 3, %v163_v50 }
  0xc1   :  { %v192_v18 = vsub.s32 7, %v163_v50 }
  0xc2   :  { %780 = vmatpush1.bf16.msra.mxu0 %v913_v58  ;;  %823 = vmatpush1.bf16.msra.mxu1 %v915_v59  ;;  %v165_v56 = vrot.slane %v160_v53, %v164_v51  ;;  %v173_v57 = vrot.slane %v160_v53, %v172_v52  ;;  %v169_v58 = vrot.slane %v160_v53, %v168_v54 }
  0xc3   :  { %781 = vmatprep.subr.bf16.mxu0 %v922_v60  ;;  %824 = vmatprep.subr.bf16.mxu1 %v924_v61  ;;  %v177_v59 = vrot.slane %v160_v53, %v176_v55 }
  0xc6   :  { %782 = vmatpush1.bf16.msra.mxu0 %v921_v5  ;;  %825 = vmatpush1.bf16.msra.mxu1 %v923_v7 }
  0xc7   :  { %783 = vmatprep.subr.bf16.mxu0 %v930_v8  ;;  %826 = vmatprep.subr.bf16.mxu1 %v932_v9 }
  0xca   :  { %784 = vmatpush1.bf16.msra.mxu0 %v929_v14  ;;  %827 = vmatpush1.bf16.msra.mxu1 %v931_v15  ;;  %v180_v15 = vsub.s32 4, %v163_v50 }
  0xcb   :  { %785 = vmatprep.subr.bf16.mxu0 %v938_v16  ;;  %828 = vmatprep.subr.bf16.mxu1 %v940_v17  ;;  %v188_v16 = vsub.s32 6, %v163_v50  ;;  %v184_v17 = vsub.s32 5, %v163_v50 }
  0xcc   :  { %v181_v19 = vrot.slane %v160_v53, %v180_v15 }
  0xcd   :  { %v189_v20 = vrot.slane %v160_v53, %v188_v16  ;;  %v185_v21 = vrot.slane %v160_v53, %v184_v17 }
  0xce   :  { %786 = vmatpush1.bf16.msra.mxu0 %v937_v22  ;;  %829 = vmatpush1.bf16.msra.mxu1 %v939_v23  ;;  %v193_v22 = vrot.slane %v160_v53, %v192_v18 }
  0xcf   :  { %787 = vmatprep.subr.bf16.mxu0 %v946_v24  ;;  %830 = vmatprep.subr.bf16.mxu1 %v948_v25 }
  0xd2   :  { %788 = vmatpush1.bf16.msra.mxu0 %v945_v2  ;;  %831 = vmatpush1.bf16.msra.mxu1 %v947_v28 }
  0xd3   :  { %789 = vmatprep.subr.bf16.mxu0 %v954_v29  ;;  %832 = vmatprep.subr.bf16.mxu1 %v956_v30 }
  0xd6   :  { %790 = vmatpush1.bf16.msra.mxu0 %v953_v35  ;;  %833 = vmatpush1.bf16.msra.mxu1 %v955_v36 }
  0xd7   :  { %791 = vmatprep.subr.bf16.mxu0 %v962_v37  ;;  %834 = vmatprep.subr.bf16.mxu1 %v964_v38 }
  0xda   :  { %792 = vmatpush1.bf16.msra.mxu0 %v961_v43  ;;  %835 = vmatpush1.bf16.msra.mxu1 %v963_v44 }
  0xdb   :  { %793 = vmatprep.subr.bf16.mxu0 %v970_v45  ;;  %836 = vmatprep.subr.bf16.mxu1 %v972_v46 }
  0xde   :  { %794 = vmatpush1.bf16.msra.mxu0 %v969_v47  ;;  %837 = vmatpush1.bf16.msra.mxu1 %v971_v48 }
  0xe1   :  { %804 = vmatmul.mubr.bf16.vlgmr.msra.gmra.mrb[4].mxu0 %v1209_v6  ;;  %847 = vmatmul.mubr.bf16.vlgmr.msra.gmra.mrb[4].mxu1 %v1209_v6 }
 0x184   :  { %v719_v60 = vpop.f32.mrb[0].mxu0  ;;  %v762_v61 = vpop.f32.mrb[0].mxu1 }
 0x185   :  { %v720_v62 = vadd.f32 %v719_v60, %v165_v56  ;;  %v763_v63 = vadd.f32 %v762_v61, %v173_v57  ;;  %v721_v3 = vpop.f32.mrb[1].mxu0  ;;  %v764_v6 = vpop.f32.mrb[1].mxu1 }
 0x186   :  { %v722_v4 = vadd.f32 %v721_v3, %v169_v58  ;;  %v765_v5 = vadd.f32 %v764_v6, %v177_v59  ;;  %v723_v7 = vpop.f32.mrb[2].mxu0  ;;  %v766_v8 = vpop.f32.mrb[2].mxu1 }
 0x187   :  { %857 = vst [vmem:[%s1393_s3] sm:$0xff] %v720_v62  ;;  %859 = vst [vmem:[%s1393_s3 + $0x10] sm:$0xff] %v763_v63  ;;  %v724_v9 = vadd.f32 %v723_v7, %v165_v56  ;;  %v767_v10 = vadd.f32 %v766_v8, %v173_v57  ;;  %v725_v11 = vpop.f32.mrb[3].mxu0  ;;  %v768_v12 = vpop.f32.mrb[3].mxu1 }
 0x188   :  { %858 = vst [vmem:[%s1393_s3 + $0x8] sm:$0xff] %v722_v4  ;;  %860 = vst [vmem:[%s1393_s3 + $0x18] sm:$0xff] %v765_v5  ;;  %v726_v13 = vadd.f32 %v725_v11, %v169_v58  ;;  %v769_v14 = vadd.f32 %v768_v12, %v177_v59 }
 0x189   :  { %865 = vst [vmem:[%s1393_s3 + $0x40] sm:$0xff] %v724_v9  ;;  %867 = vst [vmem:[%s1393_s3 + $0x50] sm:$0xff] %v767_v10 }
 0x18a   :  { %866 = vst [vmem:[%s1393_s3 + $0x48] sm:$0xff] %v726_v13  ;;  %868 = vst [vmem:[%s1393_s3 + $0x58] sm:$0xff] %v769_v14 }
 0x1b4   :  { %v805_v23 = vpop.f32.mrb[4].mxu0  ;;  %v848_v24 = vpop.f32.mrb[4].mxu1 }
 0x1b5   :  { %v806_v25 = vadd.f32 %v805_v23, %v181_v19  ;;  %v849_v26 = vadd.f32 %v848_v24, %v189_v20  ;;  %v807_v27 = vpop.f32.mrb[5].mxu0  ;;  %v850_v0 = vpop.f32.mrb[5].mxu1 }
 0x1b6   :  { %v808_v1 = vadd.f32 %v807_v27, %v185_v21  ;;  %v851_v2 = vadd.f32 %v850_v0, %v193_v22  ;;  %v809_v28 = vpop.f32.mrb[6].mxu0  ;;  %v852_v29 = vpop.f32.mrb[6].mxu1 }
 0x1b7   :  { %861 = vst [vmem:[%s1393_s3 + $0x20] sm:$0xff] %v806_v25  ;;  %863 = vst [vmem:[%s1393_s3 + $0x30] sm:$0xff] %v849_v26  ;;  %v810_v30 = vadd.f32 %v809_v28, %v181_v19  ;;  %v853_v31 = vadd.f32 %v852_v29, %v189_v20  ;;  %v811_v32 = vpop.f32.mrb[7].mxu0  ;;  %v854_v33 = vpop.f32.mrb[7].mxu1 }
 0x1b8   :  { %862 = vst [vmem:[%s1393_s3 + $0x28] sm:$0xff] %v808_v1  ;;  %864 = vst [vmem:[%s1393_s3 + $0x38] sm:$0xff] %v851_v2  ;;  %v812_v34 = vadd.f32 %v811_v32, %v185_v21  ;;  %v855_v35 = vadd.f32 %v854_v33, %v193_v22 }
 0x1b9   :  { %869 = vst [vmem:[%s1393_s3 + $0x60] sm:$0xff] %v810_v30  ;;  %871 = vst [vmem:[%s1393_s3 + $0x70] sm:$0xff] %v853_v31 }
 0x1ba   :  { %870 = vst [vmem:[%s1393_s3 + $0x68] sm:$0xff] %v812_v34  ;;  %872 = vst [vmem:[%s1393_s3 + $0x78] sm:$0xff] %v855_v35 }

</bundles_post_ra>
